<compile_context>
chip_gen: v5e
topology: v5e:2x2
jax: 0.10.0
libtpu: 0.0.40
codegen_flags: <defaults>
</compile_context>

<pallas_src>
import functools

import jax
import jax.numpy as jnp
from jax.experimental import pallas as pl
from jax.experimental.pallas import tpu as pltpu

SEG = 128  # lane-stripe width: every packed segment is 128 lanes wide


def decoder_step_kernel(ids_ref, h0_ref, enc_ref, emb_ref, w_ref, b_ref, out_ref):
    """One fused attention-decoder step.

    ids_ref : (B, 1)  int32     token ids
    h0_ref  : (B, H)  f32       previous hidden state
    enc_ref : (S, B, H)         encoder hidden states (native dtype)
    emb_ref : (Vp, H) f32       embedding table (rows padded to a multiple of 8)
    w_ref   : (2H, 6*SEG) f32   packed weights [attn | comb | r | z | n | out]
    b_ref   : (1, 9*SEG)  f32   packed biases  [attn | comb | bih_rzn | bhh_rzn | out]
    out_ref : (B, 3*SEG)  f32   packed outputs [out | h_new | attn_w]
    """
    f32 = jnp.float32
    B, H = h0_ref.shape
    S = enc_ref.shape[0]
    Vp = emb_ref.shape[0]

    h0 = h0_ref[...]                                                 # (B, H)

    # ---- embedding lookup: one-hot(ids) @ table on the MXU ----------------
    ids = ids_ref[...]                                               # (B, 1)
    onehot = (jax.lax.broadcasted_iota(jnp.int32, (B, Vp), 1) == ids).astype(f32)
    emb = jnp.dot(onehot, emb_ref[...], preferred_element_type=f32)  # (B, H)
    # TODO(synk): nn.Dropout(p) after the embedding is identity (eval mode);
    #             training parity would need pltpu.prng_seed / prng_random_bits.
    # TODO(synk): for a large vocab, replace the one-hot matmul with a scalar-
    #             prefetched DMA row gather.

    # ---- attn logits + attn_combine "embedded" halves in one matmul -------
    pre = jnp.dot(emb, w_ref[0:H, 0:2 * SEG], preferred_element_type=f32)   # (B, 2*SEG)

    logits = (pre[:, 0:SEG]
              + jnp.dot(h0, w_ref[H:2 * H, 0:SEG], preferred_element_type=f32)
              + b_ref[:, 0:SEG])                                     # pad lanes sit at -1e30
    m = jnp.max(logits, axis=1, keepdims=True)
    e = jnp.exp(logits - m)                                          # pads underflow to 0
    attn_w = e / jnp.sum(e, axis=1, keepdims=True)                   # exact softmax (returned)

    # ---- attn_applied[b,h] = sum_{s<S} attn_w[b,s] * enc[s,b,h] -----------
    # torch crops the softmax weights to S AFTER the softmax; the implicit crop
    # in this S-loop matches that exactly. Per-tile cast = free if already f32.
    attn_applied = attn_w[:, 0:1] * enc_ref[0].astype(f32)
    for s in range(1, S):
        attn_applied = attn_applied + attn_w[:, s:s + 1] * enc_ref[s].astype(f32)

    # ---- attn_combine + ReLU ----------------------------------------------
    comb = (pre[:, SEG:2 * SEG]
            + jnp.dot(attn_applied, w_ref[H:2 * H, SEG:2 * SEG], preferred_element_type=f32)
            + b_ref[:, SEG:2 * SEG])
    gx = jnp.maximum(comb[:, 0:H], 0.0)                              # (B, H) GRU input

    # ---- single-step GRU; 128-lane gate stripes -> rotate-free slices -----
    gi = jnp.dot(gx, w_ref[0:H, 2 * SEG:5 * SEG],
                 preferred_element_type=f32) + b_ref[:, 2 * SEG:5 * SEG]      # (B, 3*SEG)
    gh = jnp.dot(h0, w_ref[H:2 * H, 2 * SEG:5 * SEG],
                 preferred_element_type=f32) + b_ref[:, 5 * SEG:8 * SEG]      # (B, 3*SEG)
    r = jax.nn.sigmoid(gi[:, 0:H] + gh[:, 0:H])
    z = jax.nn.sigmoid(gi[:, SEG:SEG + H] + gh[:, SEG:SEG + H])
    n = jnp.tanh(gi[:, 2 * SEG:2 * SEG + H] + r * gh[:, 2 * SEG:2 * SEG + H])
    h_new = (1.0 - z) * n + z * h0                                   # (B, H)

    # ---- output projection (full 128-lane segment; pad cols are zero) -----
    out = jnp.dot(h_new, w_ref[0:H, 5 * SEG:6 * SEG],
                  preferred_element_type=f32) + b_ref[:, 8 * SEG:9 * SEG]     # (B, SEG)

    # ---- single lane-dense output slab: [ out | h_new | attn_w ] ----------
    out_ref[:, 0:SEG] = out                                          # unmasked store
    out_ref[:, 2 * SEG:3 * SEG] = attn_w                             # unmasked store
    out_ref[:, SEG:2 * SEG] = jnp.zeros((B, SEG), f32)               # keep slab fully defined
    out_ref[:, SEG:SEG + H] = h_new                                  # one masked 32-lane store


def init_params(key, *, vocab, hidden, max_length, output_size):
    """Natural parameters (torch-like, but stored (in, out) so kernel does x @ W)."""
    ks = jax.random.split(key, 11)
    s = 0.1
    return {
        "embedding": s * jax.random.normal(ks[0], (vocab, hidden), jnp.float32),
        "attn_w":    s * jax.random.normal(ks[1], (2 * hidden, max_length), jnp.float32),
        "attn_b":    s * jax.random.normal(ks[2], (max_length,), jnp.float32),
        "comb_w":    s * jax.random.normal(ks[3], (2 * hidden, hidden), jnp.float32),
        "comb_b":    s * jax.random.normal(ks[4], (hidden,), jnp.float32),
        "gru_wih":   s * jax.random.normal(ks[5], (hidden, 3 * hidden), jnp.float32),
        "gru_whh":   s * jax.random.normal(ks[6], (hidden, 3 * hidden), jnp.float32),
        "gru_bih":   s * jax.random.normal(ks[7], (3 * hidden,), jnp.float32),
        "gru_bhh":   s * jax.random.normal(ks[8], (3 * hidden,), jnp.float32),
        "out_w":     s * jax.random.normal(ks[9], (hidden, output_size), jnp.float32),
        "out_b":     s * jax.random.normal(ks[10], (output_size,), jnp.float32),
    }


def pack_params(p):
    """Pack all weights/biases into the 3 param refs the kernel consumes.

    Done ONCE at init time (not per step). Every segment is 128 lanes wide so
    every in-kernel slice lands on a vreg boundary; pad lanes are zero except
    the attn-logit pads, which are -1e30 so softmax ignores them.
    """
    f32 = jnp.float32
    H = p["gru_wih"].shape[0]
    L = p["attn_w"].shape[1]
    O = p["out_w"].shape[1]
    V = p["embedding"].shape[0]

    # embedding table, rows padded to a multiple of 8 (one-hot pad rows hit zeros)
    Vp = -(-V // 8) * 8
    emb_tbl = jnp.zeros((Vp, H), f32).at[:V, :].set(p["embedding"])

    # weight slab (2H, 6*SEG): [attn | comb | gru_r | gru_z | gru_n | out]
    w = jnp.zeros((2 * H, 6 * SEG), f32)
    w = w.at[:, 0:L].set(p["attn_w"])                     # rows 0:H emb-part, H:2H hid-part
    w = w.at[:, SEG:SEG + H].set(p["comb_w"])             # rows 0:H emb-part, H:2H attn-applied-part
    for g in range(3):                                    # torch gate order r, z, n
        seg = (2 + g) * SEG
        w = w.at[0:H, seg:seg + H].set(p["gru_wih"][:, g * H:(g + 1) * H])
        w = w.at[H:2 * H, seg:seg + H].set(p["gru_whh"][:, g * H:(g + 1) * H])
    w = w.at[0:H, 5 * SEG:5 * SEG + O].set(p["out_w"])

    # bias slab (1, 9*SEG): [attn | comb | bih_r,z,n | bhh_r,z,n | out]
    b = jnp.zeros((1, 9 * SEG), f32)
    b = b.at[:, 0:SEG].set(-1e30)                         # softmax pad lanes
    b = b.at[0, 0:L].set(p["attn_b"])
    b = b.at[0, SEG:SEG + H].set(p["comb_b"])
    for g in range(3):
        b = b.at[0, (2 + g) * SEG:(2 + g) * SEG + H].set(p["gru_bih"][g * H:(g + 1) * H])
        b = b.at[0, (5 + g) * SEG:(5 + g) * SEG + H].set(p["gru_bhh"][g * H:(g + 1) * H])
    b = b.at[0, 8 * SEG:8 * SEG + O].set(p["out_b"])
    return emb_tbl, w, b


def attention_decoder_forward(decoder_input, hidden_input, encoder_hiddens,
                              emb_tbl, w_slab, b_slab, *, max_length, output_size):
    """Mirrors AttentionDecoderRNN.forward (num_layers == 1, eval-mode dropout)."""
    # TODO(synk): only num_layers == 1 of the nn.GRU stack is implemented.
    B = decoder_input.shape[0]
    H = hidden_input.shape[-1]
    h0 = hidden_input[0]                                             # squeeze(0) -> (B, H)

    vmem = pl.BlockSpec(memory_space=pltpu.MemorySpace.VMEM)
    slab = pl.pallas_call(
        decoder_step_kernel,
        out_shape=jax.ShapeDtypeStruct((B, 3 * SEG), jnp.float32),
        in_specs=[vmem] * 6,
        out_specs=vmem,
    )(decoder_input.astype(jnp.int32), h0, encoder_hiddens, emb_tbl, w_slab, b_slab)

    out = slab[:, 0:output_size]
    h_new = slab[:, SEG:SEG + H]
    attn_w = slab[:, 2 * SEG:2 * SEG + max_length]
    # torch shapes: (B, 1, O), (num_layers=1, B, H), (B, 1, L)
    return out[:, None, :], h_new[None, :, :], attn_w[:, None, :]


if __name__ == "__main__":
    # small, consistent shapes (batch = 8 fills the 8-sublane vreg height)
    B, H, L, S, O, V = 8, 32, 10, 8, 16, 20   # batch, hidden, max_length, enc_seq, output, vocab
    key = jax.random.PRNGKey(0)
    kp, k1, k2, k3 = jax.random.split(key, 4)

    params = init_params(kp, vocab=V, hidden=H, max_length=L, output_size=O)
    emb_tbl, w_slab, b_slab = pack_params(params)

    decoder_input = jax.random.randint(k1, (B, 1), 0, V, dtype=jnp.int32)    # token ids
    hidden_input = jax.random.normal(k2, (1, B, H), jnp.float32)             # (num_layers, B, H)
    encoder_hiddens = jax.random.normal(k3, (S, B, H), jnp.float32)          # (S, B, H)

    fwd = jax.jit(functools.partial(attention_decoder_forward,
                                    max_length=L, output_size=O))
    out, hidden, attn_weights = fwd(decoder_input, hidden_input, encoder_hiddens,
                                    emb_tbl, w_slab, b_slab)
    jax.block_until_ready((out, hidden, attn_weights))

    assert out.shape == (B, 1, O)
    assert hidden.shape == (1, B, H)
    assert attn_weights.shape == (B, 1, L)
    print("KERNEL_OK")
</pallas_src>

<mosaic_0001>
module attributes {stable_mosaic.version = 11 : i64} {
  func.func @decoder_step_kernel(%arg0: memref<8x1xi32, #tpu.memory_space<vmem>>, %arg1: memref<8x32xf32, #tpu.memory_space<vmem>>, %arg2: memref<8x8x32xf32, #tpu.memory_space<vmem>>, %arg3: memref<24x32xf32, #tpu.memory_space<vmem>>, %arg4: memref<64x768xf32, #tpu.memory_space<vmem>>, %arg5: memref<1x1152xf32, #tpu.memory_space<vmem>>, %arg6: memref<8x384xf32, #tpu.memory_space<vmem>>) attributes {dimension_semantics = [], scalar_prefetch = 0 : i64, scratch_operands = 0 : i64, tpu.core_type = #tpu.core_type<tc>} {
    %c0 = arith.constant 0 : index
    %c0_0 = arith.constant 0 : index
    %0 = vector.load %arg1[%c0, %c0_0] : memref<8x32xf32, #tpu.memory_space<vmem>>, vector<8x32xf32>
    %c0_1 = arith.constant 0 : index
    %c0_2 = arith.constant 0 : index
    %1 = vector.load %arg0[%c0_1, %c0_2] : memref<8x1xi32, #tpu.memory_space<vmem>>, vector<8x1xi32>
    %2 = tpu.iota {dimensions = array<i32: 1>} : vector<8x24xi32>
    %3 = vector.broadcast %1 : vector<8x1xi32> to vector<8x24xi32>
    %4 = arith.cmpi eq, %2, %3 : vector<8x24xi32>
    %5 = arith.extui %4 : vector<8x24xi1> to vector<8x24xi32>
    %6 = arith.sitofp %5 : vector<8x24xi32> to vector<8x24xf32>
    %c0_3 = arith.constant 0 : index
    %c0_4 = arith.constant 0 : index
    %7 = vector.load %arg3[%c0_3, %c0_4] : memref<24x32xf32, #tpu.memory_space<vmem>>, vector<24x32xf32>
    %cst = arith.constant dense<0.000000e+00> : vector<8x32xf32>
    %8 = tpu.matmul %6, %7, %cst {dimension_numbers = #tpu.dot_dimension_numbers<[1], [0], [0], [1], [0, 0, 1, 1], [], []>} : vector<8x24xf32>, vector<24x32xf32>, vector<8x32xf32> -> vector<8x32xf32>
    %c0_5 = arith.constant 0 : index
    %c0_6 = arith.constant 0 : index
    %9 = vector.load %arg4[%c0_5, %c0_6] : memref<64x768xf32, #tpu.memory_space<vmem>>, vector<32x256xf32>
    %cst_7 = arith.constant dense<0.000000e+00> : vector<8x256xf32>
    %10 = tpu.matmul %8, %9, %cst_7 {dimension_numbers = #tpu.dot_dimension_numbers<[1], [0], [0], [1], [0, 0, 1, 1], [], []>} : vector<8x32xf32>, vector<32x256xf32>, vector<8x256xf32> -> vector<8x256xf32>
    %11 = vector.extract_strided_slice %10 {offsets = [0, 0], sizes = [8, 128], strides = [1, 1]} : vector<8x256xf32> to vector<8x128xf32>
    %c32 = arith.constant 32 : index
    %c0_8 = arith.constant 0 : index
    %12 = vector.load %arg4[%c32, %c0_8] : memref<64x768xf32, #tpu.memory_space<vmem>>, vector<32x128xf32>
    %cst_9 = arith.constant dense<0.000000e+00> : vector<8x128xf32>
    %13 = tpu.matmul %0, %12, %cst_9 {dimension_numbers = #tpu.dot_dimension_numbers<[1], [0], [0], [1], [0, 0, 1, 1], [], []>} : vector<8x32xf32>, vector<32x128xf32>, vector<8x128xf32> -> vector<8x128xf32>
    %14 = arith.addf %11, %13 : vector<8x128xf32>
    %c0_10 = arith.constant 0 : index
    %c0_11 = arith.constant 0 : index
    %15 = vector.load %arg5[%c0_10, %c0_11] : memref<1x1152xf32, #tpu.memory_space<vmem>>, vector<1x128xf32>
    %16 = vector.broadcast %15 : vector<1x128xf32> to vector<8x128xf32>
    %17 = arith.addf %14, %16 : vector<8x128xf32>
    %cst_12 = arith.constant dense<0xFF800000> : vector<8xf32>
    %18 = vector.multi_reduction <maximumf>, %17, %cst_12 [1] : vector<8x128xf32> to vector<8xf32>
    %19 = vector.shape_cast %18 : vector<8xf32> to vector<8x1xf32>
    %20 = vector.broadcast %19 : vector<8x1xf32> to vector<8x128xf32>
    %21 = arith.subf %17, %20 : vector<8x128xf32>
    %22 = math.exp %21 : vector<8x128xf32>
    %cst_13 = arith.constant dense<0.000000e+00> : vector<8xf32>
    %23 = vector.multi_reduction <add>, %22, %cst_13 [1] : vector<8x128xf32> to vector<8xf32>
    %24 = vector.shape_cast %23 : vector<8xf32> to vector<8x1xf32>
    %25 = vector.broadcast %24 : vector<8x1xf32> to vector<8x128xf32>
    %26 = arith.divf %22, %25 : vector<8x128xf32>
    %27 = vector.extract_strided_slice %26 {offsets = [0, 0], sizes = [8, 1], strides = [1, 1]} : vector<8x128xf32> to vector<8x1xf32>
    %c0_14 = arith.constant 0 : index
    %c0_15 = arith.constant 0 : index
    %c0_16 = arith.constant 0 : index
    %28 = vector.load %arg2[%c0_14, %c0_15, %c0_16] : memref<8x8x32xf32, #tpu.memory_space<vmem>>, vector<1x8x32xf32>
    %29 = vector.shape_cast %28 : vector<1x8x32xf32> to vector<8x32xf32>
    %30 = vector.broadcast %27 : vector<8x1xf32> to vector<8x32xf32>
    %31 = arith.mulf %30, %29 : vector<8x32xf32>
    %32 = vector.extract_strided_slice %26 {offsets = [0, 1], sizes = [8, 1], strides = [1, 1]} : vector<8x128xf32> to vector<8x1xf32>
    %c1 = arith.constant 1 : index
    %c0_17 = arith.constant 0 : index
    %c0_18 = arith.constant 0 : index
    %33 = vector.load %arg2[%c1, %c0_17, %c0_18] : memref<8x8x32xf32, #tpu.memory_space<vmem>>, vector<1x8x32xf32>
    %34 = vector.shape_cast %33 : vector<1x8x32xf32> to vector<8x32xf32>
    %35 = vector.broadcast %32 : vector<8x1xf32> to vector<8x32xf32>
    %36 = arith.mulf %35, %34 : vector<8x32xf32>
    %37 = arith.addf %31, %36 : vector<8x32xf32>
    %38 = vector.extract_strided_slice %26 {offsets = [0, 2], sizes = [8, 1], strides = [1, 1]} : vector<8x128xf32> to vector<8x1xf32>
    %c2 = arith.constant 2 : index
    %c0_19 = arith.constant 0 : index
    %c0_20 = arith.constant 0 : index
    %39 = vector.load %arg2[%c2, %c0_19, %c0_20] : memref<8x8x32xf32, #tpu.memory_space<vmem>>, vector<1x8x32xf32>
    %40 = vector.shape_cast %39 : vector<1x8x32xf32> to vector<8x32xf32>
    %41 = vector.broadcast %38 : vector<8x1xf32> to vector<8x32xf32>
    %42 = arith.mulf %41, %40 : vector<8x32xf32>
    %43 = arith.addf %37, %42 : vector<8x32xf32>
    %44 = vector.extract_strided_slice %26 {offsets = [0, 3], sizes = [8, 1], strides = [1, 1]} : vector<8x128xf32> to vector<8x1xf32>
    %c3 = arith.constant 3 : index
    %c0_21 = arith.constant 0 : index
    %c0_22 = arith.constant 0 : index
    %45 = vector.load %arg2[%c3, %c0_21, %c0_22] : memref<8x8x32xf32, #tpu.memory_space<vmem>>, vector<1x8x32xf32>
    %46 = vector.shape_cast %45 : vector<1x8x32xf32> to vector<8x32xf32>
    %47 = vector.broadcast %44 : vector<8x1xf32> to vector<8x32xf32>
    %48 = arith.mulf %47, %46 : vector<8x32xf32>
    %49 = arith.addf %43, %48 : vector<8x32xf32>
    %50 = vector.extract_strided_slice %26 {offsets = [0, 4], sizes = [8, 1], strides = [1, 1]} : vector<8x128xf32> to vector<8x1xf32>
    %c4 = arith.constant 4 : index
    %c0_23 = arith.constant 0 : index
    %c0_24 = arith.constant 0 : index
    %51 = vector.load %arg2[%c4, %c0_23, %c0_24] : memref<8x8x32xf32, #tpu.memory_space<vmem>>, vector<1x8x32xf32>
    %52 = vector.shape_cast %51 : vector<1x8x32xf32> to vector<8x32xf32>
    %53 = vector.broadcast %50 : vector<8x1xf32> to vector<8x32xf32>
    %54 = arith.mulf %53, %52 : vector<8x32xf32>
    %55 = arith.addf %49, %54 : vector<8x32xf32>
    %56 = vector.extract_strided_slice %26 {offsets = [0, 5], sizes = [8, 1], strides = [1, 1]} : vector<8x128xf32> to vector<8x1xf32>
    %c5 = arith.constant 5 : index
    %c0_25 = arith.constant 0 : index
    %c0_26 = arith.constant 0 : index
    %57 = vector.load %arg2[%c5, %c0_25, %c0_26] : memref<8x8x32xf32, #tpu.memory_space<vmem>>, vector<1x8x32xf32>
    %58 = vector.shape_cast %57 : vector<1x8x32xf32> to vector<8x32xf32>
    %59 = vector.broadcast %56 : vector<8x1xf32> to vector<8x32xf32>
    %60 = arith.mulf %59, %58 : vector<8x32xf32>
    %61 = arith.addf %55, %60 : vector<8x32xf32>
    %62 = vector.extract_strided_slice %26 {offsets = [0, 6], sizes = [8, 1], strides = [1, 1]} : vector<8x128xf32> to vector<8x1xf32>
    %c6 = arith.constant 6 : index
    %c0_27 = arith.constant 0 : index
    %c0_28 = arith.constant 0 : index
    %63 = vector.load %arg2[%c6, %c0_27, %c0_28] : memref<8x8x32xf32, #tpu.memory_space<vmem>>, vector<1x8x32xf32>
    %64 = vector.shape_cast %63 : vector<1x8x32xf32> to vector<8x32xf32>
    %65 = vector.broadcast %62 : vector<8x1xf32> to vector<8x32xf32>
    %66 = arith.mulf %65, %64 : vector<8x32xf32>
    %67 = arith.addf %61, %66 : vector<8x32xf32>
    %68 = vector.extract_strided_slice %26 {offsets = [0, 7], sizes = [8, 1], strides = [1, 1]} : vector<8x128xf32> to vector<8x1xf32>
    %c7 = arith.constant 7 : index
    %c0_29 = arith.constant 0 : index
    %c0_30 = arith.constant 0 : index
    %69 = vector.load %arg2[%c7, %c0_29, %c0_30] : memref<8x8x32xf32, #tpu.memory_space<vmem>>, vector<1x8x32xf32>
    %70 = vector.shape_cast %69 : vector<1x8x32xf32> to vector<8x32xf32>
    %71 = vector.broadcast %68 : vector<8x1xf32> to vector<8x32xf32>
    %72 = arith.mulf %71, %70 : vector<8x32xf32>
    %73 = arith.addf %67, %72 : vector<8x32xf32>
    %74 = vector.extract_strided_slice %10 {offsets = [0, 128], sizes = [8, 128], strides = [1, 1]} : vector<8x256xf32> to vector<8x128xf32>
    %c32_31 = arith.constant 32 : index
    %c128 = arith.constant 128 : index
    %75 = vector.load %arg4[%c32_31, %c128] : memref<64x768xf32, #tpu.memory_space<vmem>>, vector<32x128xf32>
    %cst_32 = arith.constant dense<0.000000e+00> : vector<8x128xf32>
    %76 = tpu.matmul %73, %75, %cst_32 {dimension_numbers = #tpu.dot_dimension_numbers<[1], [0], [0], [1], [0, 0, 1, 1], [], []>} : vector<8x32xf32>, vector<32x128xf32>, vector<8x128xf32> -> vector<8x128xf32>
    %77 = arith.addf %74, %76 : vector<8x128xf32>
    %c0_33 = arith.constant 0 : index
    %c128_34 = arith.constant 128 : index
    %78 = vector.load %arg5[%c0_33, %c128_34] : memref<1x1152xf32, #tpu.memory_space<vmem>>, vector<1x128xf32>
    %79 = vector.broadcast %78 : vector<1x128xf32> to vector<8x128xf32>
    %80 = arith.addf %77, %79 : vector<8x128xf32>
    %81 = vector.extract_strided_slice %80 {offsets = [0, 0], sizes = [8, 32], strides = [1, 1]} : vector<8x128xf32> to vector<8x32xf32>
    %cst_35 = arith.constant 0.000000e+00 : f32
    %82 = vector.broadcast %cst_35 : f32 to vector<8x32xf32>
    %83 = arith.maximumf %81, %82 : vector<8x32xf32>
    %c0_36 = arith.constant 0 : index
    %c256 = arith.constant 256 : index
    %84 = vector.load %arg4[%c0_36, %c256] : memref<64x768xf32, #tpu.memory_space<vmem>>, vector<32x384xf32>
    %cst_37 = arith.constant dense<0.000000e+00> : vector<8x384xf32>
    %85 = tpu.matmul %83, %84, %cst_37 {dimension_numbers = #tpu.dot_dimension_numbers<[1], [0], [0], [1], [0, 0, 1, 1], [], []>} : vector<8x32xf32>, vector<32x384xf32>, vector<8x384xf32> -> vector<8x384xf32>
    %c0_38 = arith.constant 0 : index
    %c256_39 = arith.constant 256 : index
    %86 = vector.load %arg5[%c0_38, %c256_39] : memref<1x1152xf32, #tpu.memory_space<vmem>>, vector<1x384xf32>
    %87 = vector.broadcast %86 : vector<1x384xf32> to vector<8x384xf32>
    %88 = arith.addf %85, %87 : vector<8x384xf32>
    %c32_40 = arith.constant 32 : index
    %c256_41 = arith.constant 256 : index
    %89 = vector.load %arg4[%c32_40, %c256_41] : memref<64x768xf32, #tpu.memory_space<vmem>>, vector<32x384xf32>
    %cst_42 = arith.constant dense<0.000000e+00> : vector<8x384xf32>
    %90 = tpu.matmul %0, %89, %cst_42 {dimension_numbers = #tpu.dot_dimension_numbers<[1], [0], [0], [1], [0, 0, 1, 1], [], []>} : vector<8x32xf32>, vector<32x384xf32>, vector<8x384xf32> -> vector<8x384xf32>
    %c0_43 = arith.constant 0 : index
    %c640 = arith.constant 640 : index
    %91 = vector.load %arg5[%c0_43, %c640] : memref<1x1152xf32, #tpu.memory_space<vmem>>, vector<1x384xf32>
    %92 = vector.broadcast %91 : vector<1x384xf32> to vector<8x384xf32>
    %93 = arith.addf %90, %92 : vector<8x384xf32>
    %94 = vector.extract_strided_slice %88 {offsets = [0, 0], sizes = [8, 32], strides = [1, 1]} : vector<8x384xf32> to vector<8x32xf32>
    %95 = vector.extract_strided_slice %93 {offsets = [0, 0], sizes = [8, 32], strides = [1, 1]} : vector<8x384xf32> to vector<8x32xf32>
    %96 = arith.addf %94, %95 : vector<8x32xf32>
    %97 = arith.negf %96 : vector<8x32xf32>
    %98 = math.exp %97 : vector<8x32xf32>
    %cst_44 = arith.constant 1.000000e+00 : f32
    %99 = vector.broadcast %cst_44 : f32 to vector<8x32xf32>
    %100 = arith.addf %99, %98 : vector<8x32xf32>
    %101 = arith.divf %99, %100 : vector<8x32xf32>
    %102 = vector.extract_strided_slice %88 {offsets = [0, 128], sizes = [8, 32], strides = [1, 1]} : vector<8x384xf32> to vector<8x32xf32>
    %103 = vector.extract_strided_slice %93 {offsets = [0, 128], sizes = [8, 32], strides = [1, 1]} : vector<8x384xf32> to vector<8x32xf32>
    %104 = arith.addf %102, %103 : vector<8x32xf32>
    %105 = arith.negf %104 : vector<8x32xf32>
    %106 = math.exp %105 : vector<8x32xf32>
    %cst_45 = arith.constant 1.000000e+00 : f32
    %107 = vector.broadcast %cst_45 : f32 to vector<8x32xf32>
    %108 = arith.addf %107, %106 : vector<8x32xf32>
    %109 = arith.divf %107, %108 : vector<8x32xf32>
    %110 = vector.extract_strided_slice %88 {offsets = [0, 256], sizes = [8, 32], strides = [1, 1]} : vector<8x384xf32> to vector<8x32xf32>
    %111 = vector.extract_strided_slice %93 {offsets = [0, 256], sizes = [8, 32], strides = [1, 1]} : vector<8x384xf32> to vector<8x32xf32>
    %112 = arith.mulf %101, %111 : vector<8x32xf32>
    %113 = arith.addf %110, %112 : vector<8x32xf32>
    %114 = math.tanh %113 : vector<8x32xf32>
    %cst_46 = arith.constant 1.000000e+00 : f32
    %115 = vector.broadcast %cst_46 : f32 to vector<8x32xf32>
    %116 = arith.subf %115, %109 : vector<8x32xf32>
    %117 = arith.mulf %116, %114 : vector<8x32xf32>
    %118 = arith.mulf %109, %0 : vector<8x32xf32>
    %119 = arith.addf %117, %118 : vector<8x32xf32>
    %c0_47 = arith.constant 0 : index
    %c640_48 = arith.constant 640 : index
    %120 = vector.load %arg4[%c0_47, %c640_48] : memref<64x768xf32, #tpu.memory_space<vmem>>, vector<32x128xf32>
    %cst_49 = arith.constant dense<0.000000e+00> : vector<8x128xf32>
    %121 = tpu.matmul %119, %120, %cst_49 {dimension_numbers = #tpu.dot_dimension_numbers<[1], [0], [0], [1], [0, 0, 1, 1], [], []>} : vector<8x32xf32>, vector<32x128xf32>, vector<8x128xf32> -> vector<8x128xf32>
    %c0_50 = arith.constant 0 : index
    %c1024 = arith.constant 1024 : index
    %122 = vector.load %arg5[%c0_50, %c1024] : memref<1x1152xf32, #tpu.memory_space<vmem>>, vector<1x128xf32>
    %123 = vector.broadcast %122 : vector<1x128xf32> to vector<8x128xf32>
    %124 = arith.addf %121, %123 : vector<8x128xf32>
    %c0_51 = arith.constant 0 : index
    %c0_52 = arith.constant 0 : index
    %125 = vector.load %arg6[%c0_51, %c0_52] : memref<8x384xf32, #tpu.memory_space<vmem>>, vector<8x128xf32>
    tpu.vector_store %arg6[%c0_51, %c0_52], %124 {strides = array<i32>} : memref<8x384xf32, #tpu.memory_space<vmem>>, vector<8x128xf32>,
    %c0_53 = arith.constant 0 : index
    %c256_54 = arith.constant 256 : index
    %126 = vector.load %arg6[%c0_53, %c256_54] : memref<8x384xf32, #tpu.memory_space<vmem>>, vector<8x128xf32>
    tpu.vector_store %arg6[%c0_53, %c256_54], %26 {strides = array<i32>} : memref<8x384xf32, #tpu.memory_space<vmem>>, vector<8x128xf32>,
    %cst_55 = arith.constant 0.000000e+00 : f32
    %127 = vector.broadcast %cst_55 : f32 to vector<8x128xf32>
    %c0_56 = arith.constant 0 : index
    %c128_57 = arith.constant 128 : index
    %128 = vector.load %arg6[%c0_56, %c128_57] : memref<8x384xf32, #tpu.memory_space<vmem>>, vector<8x128xf32>
    tpu.vector_store %arg6[%c0_56, %c128_57], %127 {strides = array<i32>} : memref<8x384xf32, #tpu.memory_space<vmem>>, vector<8x128xf32>,
    %c0_58 = arith.constant 0 : index
    %c128_59 = arith.constant 128 : index
    %129 = vector.load %arg6[%c0_58, %c128_59] : memref<8x384xf32, #tpu.memory_space<vmem>>, vector<8x32xf32>
    tpu.vector_store %arg6[%c0_58, %c128_59], %119 {strides = array<i32>} : memref<8x384xf32, #tpu.memory_space<vmem>>, vector<8x32xf32>,
    return
  }
}

</mosaic_0001>

<bundles_post_ra>
// kernel: attention_decoder_forward.1
= control target key start
LH: loop header
LB: loop body
LE: loop exit
PB: predicated region body
PF: predicated region fallthrough
CT: control target
= control target key end

     0   :  { %11 = vsyncpa [#allocation3], 0  ;;  %s851_s0 = inlined_call_operand.vmem [shape: s32[8,1], index: 0, kind: input, shape index: {}]   ;;  %s852_s1 = inlined_call_operand.hbm [shape: f32[8,32], index: 1, kind: input, shape index: {}]   ;;  %s853_s2 = inlined_call_operand.hbm [shape: f32[8,8,32], index: 2, kind: input, shape index: {}]   ;;  %s854_s3 = inlined_call_operand.hbm [shape: f32[24,32], index: 3, kind: input, shape index: {}]   ;;  %s855_s4 = inlined_call_operand.hbm [shape: f32[64,768], index: 4, kind: input, shape index: {}]   ;;  %s856_s5 = inlined_call_operand.vmem [shape: f32[1,1152], index: 5, kind: input, shape index: {}]   ;;  %s857_s6 = inlined_call_operand.vmem [shape: f32[8,384], index: 6, kind: output, shape index: {}]  }
   0x1   :  { %12 = vsyncpa [#allocation5], 0  ;;  %s31_s23 = sshll.u32 %s853_s2, 4  ;;  %s32_s23 = int_to_ptr.hbm [resolvable:$true] %s31_s23 }
   0x2   :  { %13 = vsyncpa [#allocation8], 0  ;;  %s738_s24 = smov [#allocation4]   ;;  %s21_s28 = sshll.u32 %s852_s1, 4  ;;  %s22_s28 = int_to_ptr.hbm [resolvable:$true] %s21_s28 }
   0x3   :  { %s33_s25 = sshll.u32 %s738_s24, 4  ;;  %s739_s29 = smov 128   ;;  %s34_s25 = int_to_ptr.vmem [resolvable:$true] %s33_s25 }
   0x4   :  { %s740_s30 = smov 8   ;;  %s741_s7 = smov [#allocation2]  }
   0x5   :  { %39 = dma.hbm_to_vmem [thread:$0]  %s32_s23, 1024, %s34_s25, [#allocation5], %s739_s29, %s739_s29, %s740_s30  }
   0x6   :  { %s23_s8 = sshll.u32 %s741_s7, 4  ;;  %s44_s11 = sshll.u32 %s854_s3, 4  ;;  %s24_s8 = int_to_ptr.vmem [resolvable:$true] %s23_s8  ;;  %s45_s11 = int_to_ptr.hbm [resolvable:$true] %s44_s11 }
   0x7   :  { %26 = dma.hbm_to_vmem [thread:$0]  %s22_s28, 128, %s24_s8, [#allocation3]  }
   0x8   :  { %s57_s13 = sshll.u32 %s855_s4, 4  ;;  %s742_s14 = smov [#allocation6]   ;;  %s58_s13 = int_to_ptr.hbm [resolvable:$true] %s57_s13 }
   0x9   :  { %s46_s15 = sshll.u32 %s742_s14, 4  ;;  %s743_s1 = smov [#allocation7]   ;;  %s47_s15 = int_to_ptr.vmem [resolvable:$true] %s46_s15 }
   0xa   :  { %52 = dma.hbm_to_vmem [thread:$0]  %s45_s11, 384, %s47_s15, [#allocation5], %s739_s29, %s739_s29, %s740_s30  }
   0xb   :  { %s59_s16 = sshll.u32 %s743_s1, 4  ;;  %s744_s17 = smov 768   ;;  %s60_s16 = int_to_ptr.vmem [resolvable:$true] %s59_s16 }
   0xc   :  { %s745_s18 = smov 48  }
   0xd   :  { %65 = dma.hbm_to_vmem [thread:$0]  %s58_s13, 6144, %s60_s16, [#allocation8], %s744_s17, %s744_s17, %s745_s18  }
   0xe   :  { %732 = dma.done.wait [#allocation3], 128  }
   0xf   :  { %733 = vsyncadd [#allocation3], 4294967168 }
  0x10   :  { %734 = dma.done.wait [#allocation5], 1408  }
  0x11   :  { %735 = vsyncadd [#allocation5], 4294965888 }
  0x12   :  { %736 = dma.done.wait [#allocation8], 6144  }
  0x13   :  { %737 = vsyncadd [#allocation8], 4294961152  ;;  %v746_v0 = vmov 0   ;;  %v747_v1 = vmov 0.0   ;;  %v85_v2 = vld [vmem:[%s851_s0] sm:$0xff]  ;;  %v96_v3 = vld [vmem:[#allocation6 + $0x10] sm:$0xff]  ;;  %v86_v17 = vlaneseq }
  0x14   :  { %609 = vset.pattern.permute.xlu0 %v746_v0  ;;  %568 = vst [vmem:[%s857_s6 + $0x8] sm:$0xff] %v747_v1  ;;  %610 = vset.pattern.permute.xlu1 %v746_v0  ;;  %v95_v4 = vld [vmem:[#allocation6 + $0x8] sm:$0xff]  ;;  %v94_v5 = vld [vmem:[#allocation6] sm:$0xff]  ;;  %v175_v7 = vld [vmem:[#allocation7 + $0x120] sm:$0xff]  ;;  %vm129_vm0 = vcmask 261120   ;;  %vm97_vm1 = vcmask 195584  }
  0x15   :  { %89 = vperm.xlu0 %609, %v85_v2   ;;  %114 = vmatpush.msra.mxu0 %v96_v3  ;;  %v176_v6 = vld [vmem:[#allocation7 + $0x150] sm:$0xff]  ;;  %v128_v9 = vld [vmem:[#allocation7 + $0x98] sm:$0xff]  ;;  %v125_v11 = vld [vmem:[#allocation7 + $0x60] sm:$0xff]  ;;  %v87_v18 = vand.u32 127, %v86_v17  ;;  %v748_v33 = vmov 1   ;;  %v749_v46 = vmov 7  }
  0x16   :  { %192 = vmatpush.msra.mxu3 %v176_v6  ;;  %v127_v8 = vld [vmem:[#allocation7 + $0x90] sm:$0xff]  ;;  %165 = vmatpush.msra.mxu2 %v128_v9  ;;  %v126_v12 = vld [vmem:[#allocation7 + $0x68] sm:$0xff]  ;;  %v124_v14 = vld [vmem:[#allocation7 + $0x38] sm:$0xff]  ;;  %v750_v47 = vmov 2   ;;  %v751_v48 = vmov 6   ;;  %v752_v49 = vmov 3  }
  0x17   :  { %115 = vmatpush.msra.mxu0 %v95_v4  ;;  %v174_v10 = vld [vmem:[#allocation7 + $0xf0] sm:$0xff]  ;;  %145 = vmatpush.msra.mxu1 %v127_v8  ;;  %v173_v15 = vld [vmem:[#allocation7 + $0xc0] sm:$0xff]  ;;  %v122_v22 = vld [vmem:[#allocation7 + $0x8] sm:$0xff]  ;;  %v753_v50 = vmov 4   ;;  %v754_v51 = vmov 5  }
  0x18   :  { %193 = vmatpush.msra.mxu3 %v175_v7  ;;  %v123_v13 = vld [vmem:[#allocation7 + $0x30] sm:$0xff]  ;;  %166 = vmatpush.msra.mxu2 %v126_v12  ;;  %v808_v16 = vld [vmem:[#allocation2] sm:$0xff]  ;;  %v294_v53 = vld [vmem:[#allocation7 + $0x158] sm:$0xff] }
  0x19   :  { %116 = vmatpush.msra.mxu0 %v94_v5  ;;  %146 = vmatpush.msra.mxu1 %v125_v11  ;;  %v121_v21 = vld [vmem:[#allocation7] sm:$0xff]  ;;  %v293_v54 = vld [vmem:[#allocation7 + $0x128] sm:$0xff]  ;;  %v292_v56 = vld [vmem:[#allocation7 + $0xf8] sm:$0xff] }
  0x1a   :  { %194 = vmatpush.msra.mxu3 %v174_v10  ;;  %167 = vmatpush.msra.mxu2 %v124_v14  ;;  %v619_v25 = vld [vmem:[%s856_s5] ss:$0 sm:$0xff]  ;;  %v291_v57 = vld [vmem:[#allocation7 + $0xc8] sm:$0xff]  ;;  %v236_v62 = vld [vmem:[#allocation4 + $0x8] sm:$0xff] }
  0x1b   :  { %147 = vmatpush.msra.mxu1 %v123_v13  ;;  %611 = vset.pattern.permute.xlu2 %v748_v33  ;;  %v334_v59 = vld [vmem:[#allocation7 + $0xa0] sm:$0xff]  ;;  %v228_v61 = vld [vmem:[#allocation4] sm:$0xff]  ;;  %v244_v2 = vld [vmem:[#allocation4 + $0x10] sm:$0xff] }
  0x1c   :  { %195 = vmatpush.msra.mxu3 %v173_v15  ;;  %168 = vmatpush.msra.mxu2 %v122_v22  ;;  %v417_v60 = vld [vmem:[#allocation7 + $0x160] sm:$0xff]  ;;  %v260_v9 = vld [vmem:[#allocation4 + $0x20] sm:$0xff]  ;;  %v268_v10 = vld [vmem:[#allocation4 + $0x28] sm:$0xff] }
  0x1d   :  { %581 = vmatmul.msk.f32.vlgmr.msra.gmra.mxu3 %vm129_vm0, %v808_v16  ;;  %148 = vmatpush.msra.mxu1 %v121_v21  ;;  %v252_v6 = vld [vmem:[#allocation4 + $0x18] sm:$0xff]  ;;  %v276_v17 = vld [vmem:[#allocation4 + $0x30] sm:$0xff] }
  0x1e   :  { %618 = vset.pattern.permute.xlu0 %v749_v46  ;;  %310 = vmatpush.msrb.mxu0 %v294_v53  ;;  %v411_v33 = vld [vmem:[#allocation7 + $0x100] sm:$0xff] }
  0x1f   :  { %360 = vmatpush.msrb.mxu1 %v334_v59 }
  0x20   :  { %311 = vmatpush.msrb.mxu0 %v293_v54  ;;  %v420_v54 = vld [vmem:[%s856_s5 + $0x5] sm:$0x7] }
  0x22   :  { %312 = vmatpush.msrb.mxu0 %v292_v56  ;;  %v422_v56 = vperm.slane %v420_v54, 0 }
  0x24   :  { %313 = vmatpush.msrb.mxu0 %v291_v57 }
  0x87   :  { %v90_v19 = vpop.permute.xlu0 %89 }
  0x88   :  { %vm91_vm2 = vcmp.eq.s32.totalorder %v87_v18, %v90_v19 }
  0x89   :  { %v577_v20 = vsel %vm91_vm2, 1.0, %v747_v1 }
  0x8a   :  { %578 = vmatmul.msk.f32.vlgmr.msra.gmra.mxu0 %vm97_vm1, %v577_v20  ;;  %v284_v20 = vld [vmem:[#allocation4 + $0x38] sm:$0xff] }
  0x8b   :  { %440 = vmatpush.msra.mxu0 %v417_v60 }
  0xa0   :  { %v197_v24 = vpop.f32.mrf.mxu3 }
 0x107   :  { %v118_v23 = vpop.f32.mrf.mxu0 }
 0x108   :  { %579 = vmatmul.msk.f32.vlgmr.msra.gmra.mxu1 %vm129_vm0, %v118_v23  ;;  %580 = vmatmul.msk.f32.vlgmr.msra.gmra.mxu2 %vm129_vm0, %v118_v23 }
 0x185   :  { %v150_v26 = vpop.f32.mrf.mxu1 }
 0x186   :  { %v200_v27 = vadd.f32 %v197_v24, %v150_v26  ;;  %v335_v26 = vld [vmem:[#allocation7 + $0xa8] sm:$0xff] }
 0x187   :  { %380 = vmatpush.msrb.mxu2 %v335_v26 }
 0x188   :  { %v205_v28 = vadd.f32 %v619_v25, %v200_v27  ;;  %v336_v27 = vld [vmem:[#allocation7 + $0xb0] sm:$0xff] }
 0x189   :  { %400 = vmatpush.msrb.mxu3 %v336_v27 }
 0x18a   :  { %206 = vmax.xlane.f32.xlu0 %v205_v28 }
 0x1fd   :  { %v207_v29 = vpop.xlane.xlu0 %206 }
 0x1fe   :  { %v208_v30 = vsub.f32 %v205_v28, %v207_v29  ;;  %v331_v28 = vld [vmem:[#allocation7 + $0x70] sm:$0xff] }
 0x1ff   :  { %v414_v29 = vld [vmem:[#allocation7 + $0x130] sm:$0xff]  ;;  %361 = vmatpush.msrb.mxu1 %v331_v28 }
 0x200   :  { %v209_v31 = vmul.f32 1.442695, %v208_v30  ;;  %441 = vmatpush.msra.mxu0 %v414_v29  ;;  %v332_v30 = vld [vmem:[#allocation7 + $0x78] sm:$0xff] }
 0x201   :  { %381 = vmatpush.msrb.mxu2 %v332_v30 }
 0x202   :  { %622 = vpow2.f32 %v209_v31  ;;  %v333_v31 = vld [vmem:[#allocation7 + $0x80] sm:$0xff]  ;;  %442 = vmatpush.msra.mxu0 %v411_v33 }
 0x203   :  { %401 = vmatpush.msrb.mxu3 %v333_v31 }
 0x208   :  { %v623_v32 = vpop.eup %622 }
 0x209   :  { %211 = vadd.xlane.f32.xlu1 %v623_v32 }
 0x27c   :  { %v212_v34 = vpop.xlane.xlu1 %211 }
 0x27d   :  { %624 = vrcp.f32 %v212_v34  ;;  %v224_v38 = vand.u32 2147483648, %v212_v34  ;;  %v222_v40 = vand.u32 2147483647, %v212_v34  ;;  %vm218_vm4 = vweird.f32 %v212_v34 }
 0x27f   :  { %v225_v42 = vor.u32 1.1754944e-38, %v224_v38  ;;  %vm223_vm6 = vcmp.eq.f32.partialorder %v222_v40, 8.507059e+37  ;;  %v326_v38 = vld [vmem:[#allocation7 + $0x18] sm:$0xff]  ;;  %v418_v40 = vld [vmem:[#allocation7 + $0x168] sm:$0xff] }
 0x283   :  { %v625_v35 = vpop.eup %624 }
 0x284   :  { %v214_v36 = vmul.f32 %v625_v35, %v212_v34  ;;  %vm219_vm3 = vweird.f32 %v625_v35  ;;  %v329_v34 = vld [vmem:[#allocation7 + $0x48] sm:$0xff] }
 0x285   :  { %vm220_vm5 = vmor %vm218_vm4, %vm219_vm3  ;;  %382 = vmatpush.msrb.mxu2 %v329_v34 }
 0x286   :  { %v215_v37 = vsub.f32 1.0, %v214_v36  ;;  %v325_v36 = vld [vmem:[#allocation7 + $0x10] sm:$0xff] }
 0x287   :  { %383 = vmatpush.msrb.mxu2 %v326_v38 }
 0x288   :  { %v216_v39 = vmul.f32 %v625_v35, %v215_v37  ;;  %v408_v37 = vld [vmem:[#allocation7 + $0xd0] sm:$0xff] }
 0x289   :  { %443 = vmatpush.msra.mxu0 %v408_v37 }
 0x28a   :  { %v217_v41 = vadd.f32 %v625_v35, %v216_v39  ;;  %v327_v39 = vld [vmem:[#allocation7 + $0x20] sm:$0xff] }
 0x28c   :  { %v221_v43 = vsel %vm220_vm5, %v625_v35, %v217_v41  ;;  %v330_v35 = vld [vmem:[#allocation7 + $0x50] sm:$0xff]  ;;  %v415_v41 = vld [vmem:[#allocation7 + $0x138] sm:$0xff] }
 0x28d   :  { %v226_v44 = vsel %vm223_vm6, %v225_v42, %v221_v43  ;;  %402 = vmatpush.msrb.mxu3 %v330_v35  ;;  %v412_v42 = vld [vmem:[#allocation7 + $0x108] sm:$0xff]  ;;  %v409_v43 = vld [vmem:[#allocation7 + $0xd8] sm:$0xff] }
 0x28e   :  { %v227_v45 = vmul.f32 %v623_v32, %v226_v44  ;;  %v328_v32 = vld [vmem:[#allocation7 + $0x40] sm:$0xff]  ;;  %v419_v44 = vld [vmem:[#allocation7 + $0x170] sm:$0xff] }
 0x28f   :  { %362 = vmatpush.msrb.mxu1 %v328_v32  ;;  %403 = vmatpush.msrb.mxu3 %v327_v39 }
 0x290   :  { %567 = vst [vmem:[%s857_s6 + $0x10] sm:$0xff] %v227_v45  ;;  %238 = vperm.xlu2 %611, %v227_v45   ;;  %231 = vperm.xlu1 %610, %v227_v45  }
 0x291   :  { %363 = vmatpush.msrb.mxu1 %v325_v36  ;;  %480 = vmatpush.msra.mxu2 %v419_v44 }
 0x293   :  { %460 = vmatpush.msra.mxu1 %v418_v40 }
 0x295   :  { %461 = vmatpush.msra.mxu1 %v415_v41 }
 0x297   :  { %462 = vmatpush.msra.mxu1 %v412_v42 }
 0x298   :  { %612 = vset.pattern.permute.xlu2 %v750_v47  ;;  %616 = vset.pattern.permute.xlu1 %v751_v48  ;;  %v410_v47 = vld [vmem:[#allocation7 + $0xe0] sm:$0xff] }
 0x299   :  { %246 = vperm.xlu2 %612, %v227_v45   ;;  %278 = vperm.xlu1 %616, %v227_v45   ;;  %v620_v48 = vld [vmem:[%s856_s5 + $0x1] ss:$0 sm:$0xff] }
 0x29a   :  { %463 = vmatpush.msra.mxu1 %v409_v43 }
 0x2a1   :  { %613 = vset.pattern.permute.xlu2 %v752_v49  ;;  %v170_v49 = vpop.f32.mrf.mxu2 }
 0x2a2   :  { %254 = vperm.xlu2 %613, %v227_v45  }
 0x2aa   :  { %614 = vset.pattern.permute.xlu2 %v753_v50 }
 0x2ab   :  { %262 = vperm.xlu2 %614, %v227_v45  }
 0x2b3   :  { %615 = vset.pattern.permute.xlu2 %v754_v51 }
 0x2b4   :  { %270 = vperm.xlu2 %615, %v227_v45  }
 0x2bc   :  { %617 = vset.pattern.permute.xlu2 %v749_v46  ;;  %v413_v46 = vld [vmem:[#allocation7 + $0x110] sm:$0xff] }
 0x2bd   :  { %286 = vperm.xlu2 %617, %v227_v45   ;;  %v416_v45 = vld [vmem:[#allocation7 + $0x140] sm:$0xff] }
 0x2be   :  { %481 = vmatpush.msra.mxu2 %v416_v45 }
 0x2c0   :  { %482 = vmatpush.msra.mxu2 %v413_v46 }
 0x2c2   :  { %483 = vmatpush.msra.mxu2 %v410_v47 }
 0x2ea   :  { %v239_v52 = vpop.permute.xlu2 %238 }
 0x2eb   :  { %v241_v1 = vmul.f32 %v239_v52, %v236_v62 }
 0x2f3   :  { %v247_v55 = vpop.permute.xlu2 %246 }
 0x2f4   :  { %v249_v5 = vmul.f32 %v247_v55, %v244_v2  ;;  %v337_v55 = vld [vmem:[%s856_s5 + $0x2] sm:$0x7] }
 0x2fc   :  { %v255_v58 = vpop.permute.xlu2 %254 }
 0x2fd   :  { %v257_v8 = vmul.f32 %v255_v58, %v252_v6  ;;  %v339_v58 = vperm.slane %v337_v55, 0  ;;  %v538_v6 = vld [vmem:[#allocation7 + $0xb8] sm:$0xff] }
 0x2fe   :  { %558 = vmatpush.msra.mxu3 %v538_v6 }
 0x302   :  { %v232_v63 = vpop.permute.xlu1 %231 }
 0x303   :  { %v234_v0 = vmul.f32 %v232_v63, %v228_v61 }
 0x305   :  { %v263_v3 = vpop.permute.xlu2 %262  ;;  %v242_v4 = vadd.f32 %v241_v1, %v234_v0  ;;  %v340_v0 = vperm.slane %v337_v55, 1  ;;  %v423_v1 = vperm.slane %v420_v54, 1 }
 0x306   :  { %v265_v13 = vmul.f32 %v263_v3, %v260_v9  ;;  %v536_v9 = vld [vmem:[#allocation7 + $0x58] sm:$0xff] }
 0x307   :  { %v250_v7 = vadd.f32 %v249_v5, %v242_v4 }
 0x309   :  { %v258_v11 = vadd.f32 %v257_v8, %v250_v7  ;;  %v537_v8 = vld [vmem:[#allocation7 + $0x88] sm:$0xff] }
 0x30a   :  { %559 = vmatpush.msra.mxu3 %v537_v8 }
 0x30b   :  { %v266_v15 = vadd.f32 %v265_v13, %v258_v11  ;;  %v279_v18 = vpop.permute.xlu1 %278 }
 0x30c   :  { %v281_v21 = vmul.f32 %v279_v18, %v276_v17  ;;  %560 = vmatpush.msra.mxu3 %v536_v9 }
 0x30e   :  { %v271_v12 = vpop.permute.xlu2 %270 }
 0x30f   :  { %v273_v14 = vmul.f32 %v271_v12, %v268_v10  ;;  %v535_v12 = vld [vmem:[#allocation7 + $0x28] sm:$0xff] }
 0x310   :  { %561 = vmatpush.msra.mxu3 %v535_v12 }
 0x311   :  { %v274_v19 = vadd.f32 %v273_v14, %v266_v15 }
 0x313   :  { %v282_v23 = vadd.f32 %v281_v21, %v274_v19  ;;  %v424_v19 = vperm.slane %v420_v54, 2 }
 0x317   :  { %v287_v22 = vpop.permute.xlu2 %286 }
 0x318   :  { %v289_v24 = vmul.f32 %v287_v22, %v284_v20 }
 0x31a   :  { %v290_v25 = vadd.f32 %v289_v24, %v282_v23 }
 0x31c   :  { %582 = vmatmul.msk.f32.vlgmr.msrb.gmra.mxu0 %vm129_vm0, %v290_v25  ;;  %v341_v25 = vperm.slane %v337_v55, 2 }
 0x324   :  { %586 = vmatmul.msk.f32.vlgmr.msra.gmra.mxu0 %vm129_vm0, %v808_v16 }
 0x399   :  { %v315_v50 = vpop.f32.mrf.mxu0 }
 0x39a   :  { %v318_v51 = vadd.f32 %v315_v50, %v170_v49  ;;  %v621_v50 = vld [vmem:[%s856_s5 + $0x8] ss:$0 sm:$0xff] }
 0x39c   :  { %v323_v52 = vadd.f32 %v620_v48, %v318_v51 }
 0x39e   :  { %v324_v53 = vmax.f32 %v323_v52, 0.0 }
 0x3a0   :  { %583 = vmatmul.msk.f32.vlgmr.msrb.gmra.mxu1 %vm129_vm0, %v324_v53  ;;  %584 = vmatmul.msk.f32.vlgmr.msrb.gmra.mxu2 %vm129_vm0, %v324_v53 }
 0x3a1   :  { %585 = vmatmul.msk.f32.vlgmr.msrb.gmra.mxu3 %vm129_vm0, %v324_v53  ;;  %v445_v57 = vpop.f32.mrf.mxu0 }
 0x3a2   :  { %v446_v59 = vadd.f32 %v445_v57, %v422_v56 }
 0x3a8   :  { %587 = vmatmul.msk.f32.vlgmr.msra.gmra.mxu1 %vm129_vm0, %v808_v16  ;;  %588 = vmatmul.msk.f32.vlgmr.msra.gmra.mxu2 %vm129_vm0, %v808_v16 }
 0x41d   :  { %v365_v60 = vpop.f32.mrf.mxu1 }
 0x41e   :  { %v366_v61 = vadd.f32 %v365_v60, %v339_v58 }
 0x420   :  { %v488_v62 = vadd.f32 %v446_v59, %v366_v61 }
 0x422   :  { %v589_v63 = vmul.f32 -1.442695, %v488_v62 }
 0x423   :  { %v385_v2 = vpop.f32.mrf.mxu2 }
 0x424   :  { %626 = vpow2.f32 %v589_v63  ;;  %v386_v4 = vadd.f32 %v385_v2, %v340_v0  ;;  %v405_v29 = vpop.f32.mrf.mxu3 }
 0x425   :  { %v465_v3 = vpop.f32.mrf.mxu1  ;;  %v406_v34 = vadd.f32 %v405_v29, %v341_v25 }
 0x426   :  { %v466_v5 = vadd.f32 %v465_v3, %v423_v1 }
 0x428   :  { %v508_v7 = vadd.f32 %v466_v5, %v386_v4 }
 0x42a   :  { %v627_v10 = vpop.eup %626  ;;  %v590_v11 = vmul.f32 -1.442695, %v508_v7 }
 0x42b   :  { %v492_v13 = vadd.f32 1.0, %v627_v10  ;;  %v485_v21 = vpop.f32.mrf.mxu2 }
 0x42c   :  { %628 = vpow2.f32 %v590_v11  ;;  %v486_v26 = vadd.f32 %v485_v21, %v424_v19 }
 0x42d   :  { %630 = vrcp.f32 %v492_v13  ;;  %v504_v22 = vand.u32 2147483648, %v492_v13  ;;  %v502_v24 = vand.u32 2147483647, %v492_v13  ;;  %vm498_vm8 = vweird.f32 %v492_v13 }
 0x42f   :  { %v505_v30 = vor.u32 1.1754944e-38, %v504_v22  ;;  %vm503_vm10 = vcmp.eq.f32.partialorder %v502_v24, 8.507059e+37 }
 0x432   :  { %v629_v14 = vpop.eup %628 }
 0x433   :  { %v631_v15 = vpop.eup %630  ;;  %v512_v17 = vadd.f32 1.0, %v629_v14 }
 0x434   :  { %v494_v18 = vmul.f32 %v631_v15, %v492_v13  ;;  %vm499_vm7 = vweird.f32 %v631_v15 }
 0x435   :  { %632 = vrcp.f32 %v512_v17  ;;  %vm500_vm9 = vmor %vm498_vm8, %vm499_vm7  ;;  %v524_v37 = vand.u32 2147483648, %v512_v17  ;;  %v522_v39 = vand.u32 2147483647, %v512_v17  ;;  %vm518_vm12 = vweird.f32 %v512_v17 }
 0x436   :  { %v495_v20 = vsub.f32 1.0, %v494_v18 }
 0x437   :  { %v525_v42 = vor.u32 1.1754944e-38, %v524_v37  ;;  %vm523_vm14 = vcmp.eq.f32.partialorder %v522_v39, 8.507059e+37 }
 0x438   :  { %v496_v23 = vmul.f32 %v631_v15, %v495_v20 }
 0x43a   :  { %v497_v27 = vadd.f32 %v631_v15, %v496_v23 }
 0x43b   :  { %v633_v28 = vpop.eup %632 }
 0x43c   :  { %v514_v31 = vmul.f32 %v633_v28, %v512_v17  ;;  %v501_v32 = vsel %vm500_vm9, %v631_v15, %v497_v27  ;;  %vm519_vm11 = vweird.f32 %v633_v28 }
 0x43d   :  { %v506_v33 = vsel %vm503_vm10, %v505_v30, %v501_v32  ;;  %vm520_vm13 = vmor %vm518_vm12, %vm519_vm11 }
 0x43e   :  { %v515_v35 = vsub.f32 1.0, %v514_v31  ;;  %v528_v36 = vmul.f32 %v506_v33, %v486_v26 }
 0x440   :  { %v516_v38 = vmul.f32 %v633_v28, %v515_v35  ;;  %v529_v40 = vadd.f32 %v528_v36, %v406_v34 }
 0x442   :  { %v517_v41 = vadd.f32 %v633_v28, %v516_v38  ;;  %634 = vtanh.f32 %v529_v40 }
 0x444   :  { %v521_v43 = vsel %vm520_vm13, %v633_v28, %v517_v41 }
 0x445   :  { %v526_v44 = vsel %vm523_vm14, %v525_v42, %v521_v43 }
 0x446   :  { %v531_v45 = vsub.f32 1.0, %v526_v44  ;;  %v533_v48 = vmul.f32 %v526_v44, %v808_v16 }
 0x448   :  { %v635_v46 = vpop.eup %634 }
 0x449   :  { %v532_v47 = vmul.f32 %v635_v46, %v531_v45 }
 0x44b   :  { %v534_v49 = vadd.f32 %v533_v48, %v532_v47 }
 0x44d   :  { %591 = vmatmul.msk.f32.vlgmr.msra.gmra.mxu3 %vm129_vm0, %v534_v49  ;;  %569 = vst.msk [vmem:[%s857_s6 + $0x8] sm:$0xff] %vm129_vm0, %v534_v49 }
 0x4d0   :  { %v563_v51 = vpop.f32.mrf.mxu3 }
 0x4d1   :  { %v564_v52 = vadd.f32 %v621_v50, %v563_v51 }
 0x4d3   :  { %566 = vst [vmem:[%s857_s6] sm:$0xff] %v564_v52 }
 0x4d4   :  { %574 = vsyncpa [#allocation3], 1 }
 0x4d5   :  { %575 = vsyncpa [#allocation5], 1 }
 0x4d6   :  { %576 = vsyncpa [#allocation8], 1 }

</bundles_post_ra>
